<compile_context>
chip_gen: v5e
topology: v5e:2x2
jax: 0.10.0
libtpu: 0.0.40
codegen_flags: <defaults>
</compile_context>

<pallas_src>
import functools
from typing import Dict, List

import jax
import jax.numpy as jnp
from jax.experimental import pallas as pl
from jax.experimental.pallas import tpu as pltpu


def _ce_kernel(logits_ref, labels_ref, loss_ref, *, ignore_index):
    logits = logits_ref[...].astype(jnp.float32)            # (TN, C) f32
    labels = labels_ref[...]                                 # (TN, 1) int32
    tn, c = logits.shape

    # rows that contribute (excludes ignore_index, padded labels, OOB labels).
    # This also masks the ragged last tile's garbage rows (their labels were
    # padded with ignore_index in the wrapper).
    valid = (labels != ignore_index) & (labels >= 0) & (labels < c)   # (TN, 1)

    # numerically stable log-sum-exp over the class (lane) axis
    row_max = jnp.max(logits, axis=-1, keepdims=True)                 # (TN, 1)
    sum_exp = jnp.sum(jnp.exp(logits - row_max), axis=-1, keepdims=True)

    # target gather from the RAW logits via a (1, C) iota (broadcast compare);
    # nll = row_max + log(sum_exp) - tgt_logit  (identical to lse - tgt).
    class_ids = jax.lax.broadcasted_iota(jnp.int32, (1, c), 1)        # (1, C)
    tgt_logit = jnp.sum(jnp.where(class_ids == labels, logits, 0.0),
                        axis=-1, keepdims=True)                       # (TN, 1)

    nll = row_max + jnp.log(sum_exp) - tgt_logit                      # (TN, 1)
    nll = jnp.where(valid, nll, 0.0)

    # one partial sum per tile, written to this tile's own lane-dense block
    loss_ref[...] = jnp.full(loss_ref.shape, jnp.sum(nll), jnp.float32)


def _round_up(x: int, m: int) -> int:
    return ((x + m - 1) // m) * m


def _cdiv(a: int, b: int) -> int:
    return (a + b - 1) // b


def _vmem_budgets():
    """(vmem_limit_bytes, per-tile working-set budget in bytes), per generation."""
    cap = None
    try:
        info = pltpu.get_tpu_info()
        cap = getattr(info, "vmem_capacity_bytes", None)
    except Exception:
        cap = None
    if cap is not None and cap > 64 * 1024 * 1024:
        # v5e / v6e: 128 MiB physical VMEM — raise the scoped limit, big tiles.
        return 80 * 1024 * 1024, 16 * 1024 * 1024
    # v7x (64 MiB/TC) or unknown: stay conservative.
    return 48 * 1024 * 1024, 8 * 1024 * 1024


def cross_entropy_pallas(logits: jax.Array, targets: jax.Array, *,
                         ignore_index: int = -100, tile_n: int | None = None):
    """Mean cross-entropy over [N, C] logits with int targets [N] (F.cross_entropy).

    Note: if the producer can emit bf16 logits, feeding bf16 here halves HBM
    traffic (the LSE math stays f32 in-kernel).
    """
    n, c = logits.shape
    dtype_bytes = jnp.dtype(logits.dtype).itemsize
    vmem_limit, tile_budget = _vmem_budgets()

    # --- tile sizing: by bytes, in f32 working-set terms ---
    if tile_n is None:
        # per row: 2x double-buffered input tile + ~4 tile-sized f32 temporaries
        bytes_per_row = c * (2 * dtype_bytes + 4 * 4)
        tile_n = max(8, min(32768, tile_budget // max(1, bytes_per_row)))
    tile_n = max(8, (tile_n // 8) * 8)                  # sublane multiple
    tile_n = min(tile_n, _round_up(n, 8))               # don't over-pad tiny batches
    if n > 8:
        # produce >= 2 grid tiles so both v7x TensorCores get work
        tile_n = min(tile_n, max(8, _round_up(_cdiv(n, 2), 8)))

    num_tiles = _cdiv(n, tile_n)
    n_lab = num_tiles * tile_n

    # Only the tiny labels array is padded (ignore_index => masked in-kernel).
    # The full [N, C] logits are NOT copied/padded: the ragged last tile's
    # out-of-bounds rows are garbage that the label mask zeroes out.
    labels = targets.astype(jnp.int32).reshape(n, 1)
    if n_lab != n:
        labels = jnp.pad(labels, ((0, n_lab - n), (0, 0)),
                         constant_values=ignore_index)

    kernel = functools.partial(_ce_kernel, ignore_index=ignore_index)

    cost = pl.CostEstimate(
        flops=6 * n * c,
        transcendentals=n * c + n,                      # exp per element + log per row
        bytes_accessed=n * c * dtype_bytes + n_lab * 4 + num_tiles * 128 * 4,
    )

    partials = pl.pallas_call(
        kernel,
        out_shape=jax.ShapeDtypeStruct((num_tiles, 1, 128), jnp.float32),
        grid_spec=pltpu.PrefetchScalarGridSpec(
            num_scalar_prefetch=0,
            grid=(num_tiles,),
            in_specs=[
                pl.BlockSpec((tile_n, c), lambda i: (i, 0)),     # logits tile
                pl.BlockSpec((tile_n, 1), lambda i: (i, 0)),     # labels tile
            ],
            # each grid step owns its own output block → grid axis is parallel
            out_specs=pl.BlockSpec((1, 1, 128), lambda i: (i, 0, 0)),
        ),
        compiler_params=pltpu.CompilerParams(
            dimension_semantics=("parallel",),
            vmem_limit_bytes=vmem_limit,
        ),
        cost_estimate=cost,
    )(logits, labels)

    total = jnp.sum(partials[:, 0, 0])

    # mean over non-ignored examples (matches F.cross_entropy reduction='mean');
    # guard count == 0 to avoid NaN.
    t = targets.astype(jnp.int32)
    valid = (t != ignore_index) & (t >= 0) & (t < c)
    count = jnp.sum(valid).astype(jnp.float32)
    return jnp.where(count > 0, total / jnp.maximum(count, 1.0), 0.0)


class BaseCriterion:
    """JAX/Pallas analog of the PyTorch BaseCriterion (criterions/cross_entropy.py)."""

    def __init__(self, losses: List[str], weight_dict: Dict[str, float]):
        self.losses = losses
        self.weight_dict = weight_dict

    # concrete loss: cross-entropy (file is cross_entropy.py) — hot path in Pallas
    def loss_ce(self, outputs, targets, **kwargs):
        return {"loss_ce": cross_entropy_pallas(outputs, targets)}

    def forward(self, outputs, targets, **kwargs):
        losses = {}
        for loss in self.losses:
            losses.update(getattr(self, f"loss_{loss}")(outputs, targets, **kwargs))
        return losses
        # TODO(synk): the original PyTorch forward has no `return losses`; returning
        # the dict here so the result is observable.

    __call__ = forward


if __name__ == "__main__":
    key = jax.random.PRNGKey(0)
    k1, k2 = jax.random.split(key)

    # --- check 1: the module forward, tile-aligned shapes ---
    N, C = 16, 32
    logits = jax.random.normal(k1, (N, C), dtype=jnp.float32)
    targets = jax.random.randint(k2, (N,), 0, C, dtype=jnp.int32)

    criterion = BaseCriterion(losses=["ce"], weight_dict={"loss_ce": 1.0})
    losses = criterion(logits, targets)
    loss = jax.block_until_ready(losses["loss_ce"])

    ref = jnp.mean(
        jax.nn.logsumexp(logits, axis=-1)
        - jnp.take_along_axis(logits, targets[:, None], axis=-1)[:, 0]
    )
    assert jnp.allclose(loss, ref, rtol=1e-5, atol=1e-5), (loss, ref)

    # --- check 2: non-tile-aligned N (ragged last tile, no logits pad) + ignored label ---
    N2, C2 = 13, 40
    logits2 = jax.random.normal(k1, (N2, C2), dtype=jnp.float32)
    targets2 = jax.random.randint(k2, (N2,), 0, C2, dtype=jnp.int32)
    targets2 = targets2.at[3].set(-100)

    loss2 = jax.block_until_ready(cross_entropy_pallas(logits2, targets2))
    valid2 = targets2 != -100
    per_ex = (
        jax.nn.logsumexp(logits2, axis=-1)
        - jnp.take_along_axis(logits2, jnp.clip(targets2, 0, C2 - 1)[:, None], axis=-1)[:, 0]
    )
    ref2 = jnp.sum(jnp.where(valid2, per_ex, 0.0)) / jnp.sum(valid2)
    assert jnp.allclose(loss2, ref2, rtol=1e-5, atol=1e-5), (loss2, ref2)

    # --- check 3: all targets ignored → guarded (no NaN) ---
    targets3 = jnp.full((N2,), -100, dtype=jnp.int32)
    loss3 = jax.block_until_ready(cross_entropy_pallas(logits2, targets3))
    assert jnp.isfinite(loss3), loss3

    print("KERNEL_OK")
</pallas_src>

<mosaic_0001>
module attributes {stable_mosaic.version = 11 : i64} {
  func.func @_ce_kernel(%arg0: i32, %arg1: memref<8x32xf32, #tpu.memory_space<vmem>>, %arg2: memref<8x1xi32, #tpu.memory_space<vmem>>, %arg3: memref<1x1x128xf32, #tpu.memory_space<vmem>>) attributes {dimension_semantics = [#tpu.dimension_semantics<parallel>], iteration_bounds = array<i64: 2>, scalar_prefetch = 0 : i64, scratch_operands = 0 : i64, tpu.core_type = #tpu.core_type<tc>, window_params = [{transform_indices = @transform_0, window_bounds = array<i64: 8, 32>}, {transform_indices = @transform_1, window_bounds = array<i64: 8, 1>}, {transform_indices = @transform_2, window_bounds = array<i64: 1, 1, 128>}]} {
    %c0 = arith.constant 0 : index
    %c0_0 = arith.constant 0 : index
    %0 = vector.load %arg1[%c0, %c0_0] : memref<8x32xf32, #tpu.memory_space<vmem>>, vector<8x32xf32>
    %c0_1 = arith.constant 0 : index
    %c0_2 = arith.constant 0 : index
    %1 = vector.load %arg2[%c0_1, %c0_2] : memref<8x1xi32, #tpu.memory_space<vmem>>, vector<8x1xi32>
    %c-100_i32 = arith.constant -100 : i32
    %2 = vector.broadcast %c-100_i32 : i32 to vector<8x1xi32>
    %3 = arith.cmpi ne, %1, %2 : vector<8x1xi32>
    %c0_i32 = arith.constant 0 : i32
    %4 = vector.broadcast %c0_i32 : i32 to vector<8x1xi32>
    %5 = arith.cmpi sge, %1, %4 : vector<8x1xi32>
    %6 = arith.andi %3, %5 : vector<8x1xi1>
    %c32_i32 = arith.constant 32 : i32
    %7 = vector.broadcast %c32_i32 : i32 to vector<8x1xi32>
    %8 = arith.cmpi slt, %1, %7 : vector<8x1xi32>
    %9 = arith.andi %6, %8 : vector<8x1xi1>
    %cst = arith.constant dense<0xFF800000> : vector<8xf32>
    %10 = vector.multi_reduction <maximumf>, %0, %cst [1] : vector<8x32xf32> to vector<8xf32>
    %11 = vector.shape_cast %10 : vector<8xf32> to vector<8x1xf32>
    %12 = vector.broadcast %11 : vector<8x1xf32> to vector<8x32xf32>
    %13 = arith.subf %0, %12 : vector<8x32xf32>
    %14 = math.exp %13 : vector<8x32xf32>
    %cst_3 = arith.constant dense<0.000000e+00> : vector<8xf32>
    %15 = vector.multi_reduction <add>, %14, %cst_3 [1] : vector<8x32xf32> to vector<8xf32>
    %16 = vector.shape_cast %15 : vector<8xf32> to vector<8x1xf32>
    %17 = tpu.iota {dimensions = array<i32: 1>} : vector<1x32xi32>
    %18 = vector.broadcast %17 : vector<1x32xi32> to vector<8x32xi32>
    %19 = vector.broadcast %1 : vector<8x1xi32> to vector<8x32xi32>
    %20 = arith.cmpi eq, %18, %19 : vector<8x32xi32>
    %cst_4 = arith.constant 0.000000e+00 : f32
    %21 = vector.broadcast %cst_4 : f32 to vector<8x32xf32>
    %22 = arith.select %20, %0, %21 : vector<8x32xi1>, vector<8x32xf32>
    %cst_5 = arith.constant dense<0.000000e+00> : vector<8xf32>
    %23 = vector.multi_reduction <add>, %22, %cst_5 [1] : vector<8x32xf32> to vector<8xf32>
    %24 = vector.shape_cast %23 : vector<8xf32> to vector<8x1xf32>
    %25 = math.log %16 : vector<8x1xf32>
    %26 = arith.addf %11, %25 : vector<8x1xf32>
    %27 = arith.subf %26, %24 : vector<8x1xf32>
    %cst_6 = arith.constant 0.000000e+00 : f32
    %28 = vector.broadcast %cst_6 : f32 to vector<8x1xf32>
    %29 = arith.select %9, %27, %28 : vector<8x1xi1>, vector<8x1xf32>
    %30 = vector.shape_cast %29 : vector<8x1xf32> to vector<1x8x1xf32>
    %cst_7 = arith.constant dense<0.000000e+00> : vector<1xf32>
    %31 = vector.multi_reduction <add>, %30, %cst_7 [1, 2] : vector<1x8x1xf32> to vector<1xf32>
    %32 = vector.shape_cast %31 : vector<1xf32> to vector<1x1x1xf32>
    %33 = vector.extract %32[0, 0, 0] : f32 from vector<1x1x1xf32>
    %34 = vector.broadcast %33 : f32 to vector<1x1x128xf32>
    %c0_8 = arith.constant 0 : index
    %c0_9 = arith.constant 0 : index
    %c0_10 = arith.constant 0 : index
    %35 = vector.load %arg3[%c0_8, %c0_9, %c0_10] : memref<1x1x128xf32, #tpu.memory_space<vmem>>, vector<1x1x128xf32>
    tpu.vector_store %arg3[%c0_8, %c0_9, %c0_10], %34 {strides = array<i32>} : memref<1x1x128xf32, #tpu.memory_space<vmem>>, vector<1x1x128xf32>,
    return
  }
  func.func @transform_0(%arg0: i32) -> (i32, i32) {
    %c0_i32 = arith.constant 0 : i32
    %c0_i32_0 = arith.constant 0 : i32
    return %arg0, %c0_i32 : i32, i32
  }
  func.func @transform_1(%arg0: i32) -> (i32, i32) {
    %c0_i32 = arith.constant 0 : i32
    %c0_i32_0 = arith.constant 0 : i32
    return %arg0, %c0_i32 : i32, i32
  }
  func.func @transform_2(%arg0: i32) -> (i32, i32, i32) {
    %c0_i32 = arith.constant 0 : i32
    %c0_i32_0 = arith.constant 0 : i32
    %c0_i32_1 = arith.constant 0 : i32
    return %arg0, %c0_i32, %c0_i32_0 : i32, i32, i32
  }
}

</mosaic_0001>

<bundles_post_ra>
// kernel: tpu_custom_call.1
= control target key start
LH: loop header
LB: loop body
LE: loop exit
PB: predicated region body
PF: predicated region fallthrough
CT: control target
= control target key end

     0   :  { %7 = vsyncpa [#allocation3], 0  ;;  %s506_s0 = inlined_call_operand.vmem [shape: f32[16,32], index: 0, kind: input, shape index: {}]   ;;  %s507_s1 = inlined_call_operand.vmem [shape: s32[16,1], index: 1, kind: input, shape index: {}]   ;;  %s508_s2 = inlined_call_operand.hbm [shape: f32[2,1,128], index: 2, kind: output, shape index: {}]  }
   0x1   :  { %9 = vsyncpa [#allocation3 + $0x1], 0  ;;  %s415_s9 = smov 0   ;;  %s417_s10 = smov 0  }
   0x2   :  { %s419_s11 = smov 0   ;;  %s421_s12 = smov 0  }
   0x3 LB: > { %s436_s13 = sadd.s32 4294967295, %s397_s12   ;;  %s280_s14 = sadd.s32 4294967294, %s397_s12   ;;  %s397_s12 = sphi %s421_s12, %s514_s12   ;;  %s393_s11 = sphi %s419_s11, %s513_s11   ;;  %s389_s10 = sphi %s417_s10, %s512_s10   ;;  %s385_s9 = sphi %s415_s9, %s511_s9  }
   0x4   : > { %s440_s15 = sadd.s32 1, %s397_s12   ;;  %s74_s16 = sadd.s32 1, %s393_s11 }
   0x5   : > { %s71_s17 = ssub.s32 %s397_s12, %s440_s15  ;;  %p84_p0 = scmp.ne.s32.totalorder %s393_s11, %s389_s10 }
   0x6   : > { %p72_p1 = scmp.eq.s32.totalorder %s71_s17, 0  ;;  %p85_p2 = scmp.eq.s32.totalorder %s436_s13, 1 }
   0x7   : > { %p90_p3 = scmp.ne.s32.totalorder %s389_s10, %s385_s9  ;;  %p91_p4 = scmp.eq.s32.totalorder %s280_s14, 1 }
   0x8   : > { %s451_s18 = scalar_select %p72_p1, %s393_s11, %s74_s16  }
   0x9   : > { %p453_p5 = por %p85_p2, %p84_p0  ;;  %p457_p6 = por %p91_p4, %p90_p3 }
   0xa   : > { %p283_p7 = scmp.ge.s32.totalorder %s397_s12, 1  ;;  %p123_p8 = scmp.lt.s32.totalorder %s397_s12, 3 }
   0xc   : > { %p124_p9 = pnand %p283_p7, %p123_p8 }
   0xd   : > { %p147_p10 = scmp.lt.s32.totalorder (!%p124_p9), %s436_s13, 1  ;;  %s145_s29 = sand.u32 (!%p124_p9), 1, %s389_s10  }
   0xe   : > { %127 = sbr.rel (%p124_p9) target bundleno = 466 (0x1d2), region = 28  ;;  %s209_s4 = scalar_lea.hbm (!%p124_p9), %s508_s2, %s436_s13 }
   0xf   : > { %s146_s5 = scalar_lea.vmem (!%p124_p9), [#allocation2], %s145_s29  ;;  %s213_s7 = sshll.u32 (!%p124_p9), %s209_s4, 4  ;;  %s214_s7 = int_to_ptr.hbm [resolvable:$true] %s213_s7 }
  0x10   : > { %s211_s6 = sshll.u32 (!%p124_p9), %s146_s5, 4  ;;  %s201_s14 = scalar_lea.sflag (!%p124_p9), [#allocation3], %s145_s29  ;;  %s212_s6 = int_to_ptr.vmem [resolvable:$true] %s211_s6 }
  0x11   : > { %s349_s16 = sshra.s32 (!%p124_p9), %s214_s7, 4  ;;  %s350_s16 = int_to_ptr.hbm [resolvable:$true] %s349_s16 }
  0x12   : > { %s351_s17 = scalar_lea.hbm (!%p124_p9), %s350_s16, 1  ;;  %p356_p0 = scmp.lt.s32.totalorder (!%p124_p9), %s350_s16, %s508_s2 }
  0x13   : > { %v399_v0 = vmov 0   ;;  %s148_s21 = scalar_select %p147_p10, %s436_s13, 1  ;;  %vm162_vm0 = vcmask 261120   ;;  %v172_v9 = vlaneseq  ;;  %vm187_vm7 = vcmask 7168  }
  0x14   : > { %330 = vset.pattern.permute.xlu0 %v399_v0  ;;  %p352_p11 = scmp.ne.s32.totalorder %s350_s16, %s351_s17  ;;  %s355_s13 = scalar_lea.hbm %s508_s2, 2 }
  0x15   : > { %s284_s22 = sshll.u32 %s148_s21, 3  ;;  %v173_v10 = vand.u32 127, %v172_v9  ;;  %p357_p1 = scmp.lt.s32.totalorder %s355_s13, %s351_s17 }
  0x16   : > { %s150_s25 = scalar_lea.vmem %s506_s0, %s284_s22  ;;  %s154_s28 = scalar_lea.vmem %s507_s1, %s284_s22 }
  0x17   : > { %v155_v1 = vld [vmem:[%s150_s25] sm:$0xff]  ;;  %p353_p12 = pnand %p352_p11, %p453_p5  ;;  %p358_p2 = por %p357_p1, %p356_p0 }
  0x18   : > { %v163_v2 = vsel %vm162_vm0, %v155_v1, -inf  ;;  %v156_v3 = vld [vmem:[%s154_s28] sm:$0xff] }
  0x19   : > { %164 = vmax.xlane.f32.xlu0 %v163_v2  ;;  %vm157_vm2 = vcmp.ne.s32.totalorder %v156_v3, 4294967196  ;;  %vm158_vm3 = vcmp.ge.s32.totalorder %v156_v3, 0  ;;  %vm160_vm5 = vcmp.lt.s32.totalorder %v156_v3, 32  ;;  %p354_p13 = pneg %p353_p12 }
  0x1a   : > { %vm159_vm4 = vmand %vm157_vm2, %vm158_vm3 }
  0x1b   : > { %vm161_vm6 = vmand %vm159_vm4, %vm160_vm5  ;;  %p359_p3 = pnand %p358_p2, %p354_p13 }
  0x2d   : > { %175 = vperm.xlu0 %330, %v156_v3  }
  0x8c   : > { %v165_v4 = vpop.xlane.xlu0 %164 }
  0x8d   : > { %v166_v5 = vsub.f32 %v155_v1, %v165_v4 }
  0x8f   : > { %v167_v6 = vmul.f32 1.442695, %v166_v5 }
  0x91   : > { %331 = vpow2.f32 %v167_v6 }
  0x97   : > { %v332_v7 = vpop.eup %331 }
  0x98   : > { %v169_v8 = vsel %vm162_vm0, %v332_v7, 0.0 }
  0x99   : > { %170 = vadd.xlane.f32.xlu1 %v169_v8 }
  0x9f   : > { %v176_v11 = vpop.permute.xlu0 %175 }
  0xa0   : > { %vm177_vm1 = vcmp.eq.s32.totalorder %v173_v10, %v176_v11 }
  0xa1   : > { %v178_v12 = vsel %vm177_vm1, %v155_v1, 0.0 }
  0xa2   : > { %v179_v13 = vsel %vm162_vm0, %v178_v12, 0.0 }
  0xa3   : > { %180 = vadd.xlane.f32.xlu1 %v179_v13 }
 0x10c   : > { %v171_v14 = vpop.xlane.xlu1 %170 }
 0x10d   : > { %333 = vlog2.f32 %v171_v14 }
 0x113   : > { %v334_v15 = vpop.eup %333 }
 0x114   : > { %v183_v16 = vmul.f32 0.6931472, %v334_v15 }
 0x116   : > { %v184_v17 = vadd.f32 %v183_v16, %v165_v4  ;;  %v181_v18 = vpop.xlane.xlu1 %180 }
 0x118   : > { %v185_v19 = vsub.f32 %v184_v17, %v181_v18 }
 0x11a   : > { %v186_v20 = vsel %vm161_vm6, %v185_v19, 0.0 }
 0x11b   : > { %v188_v21 = vsel %vm187_vm7, %v186_v20, 0.0 }
 0x11c   : > { %189 = vadd.xlane.f32.xlu2 %v188_v21 }
 0x18f   : > { %v190_v22 = vpop.xlane.xlu2 %189 }
 0x190   : > { %v191_v23 = vrot.slane %v190_v22, 4 }
 0x192   : > { %v192_v24 = vadd.f32 %v191_v23, %v190_v22 }
 0x194   : > { %v193_v25 = vrot.slane %v192_v24, 2 }
 0x196   : > { %v194_v26 = vadd.f32 %v193_v25, %v192_v24 }
 0x198   : > { %v195_v27 = vrot.slane %v194_v26, 1 }
 0x19a   : > { %v196_v28 = vadd.f32 %v195_v27, %v194_v26 }
 0x19c   : > { %288 = vpush %v196_v28 }
 0x1cd   : > { %s289_s8 = spop %288 }
 0x1ce   : > { %v198_v29 = vstv %s289_s8 }
 0x1cf   : > { %199 = vst [vmem:[%s146_s5] sm:$0x1] %v198_v29 }
 0x1d0   : > { %362 = shalt.err (!%p359_p3)
}
 0x1d1   : > { %290 = dma.vmem_to_hbm [thread:$0]  (%p453_p5), %s212_s6, 16, %s214_s7, %s201_s14  }
 0x1d2 PF: > { %p296_p4 = scmp.ge.s32.totalorder %s397_s12, 2  ;;  %s225_s25 = sand.u32 1, %s385_s9  }
 0x1d3   : > { %s226_s26 = scalar_lea.sflag [#allocation3], %s225_s25 }
 0x1d4   : > { %p293_p7 = pnand %p296_p4, %p457_p6 }
 0x1d6   : > { %p294_p8 = pneg %p293_p7 }
 0x1d8   : > { %380 = dma.done.wait (%p294_p8), %s226_s26, 16  }
 0x1d9   : > { %382 = vsyncadd (%p294_p8), %s226_s26, 4294967280  ;;  %p12_p9 = scmp.ge.s32.totalorder %s440_s15, 4   ;;  %s511_s9 = smov %s389_s10 }
 0x1da   : > { %s512_s10 = smov %s393_s11  ;;  %s513_s11 = smov %s451_s18 }
 0x1db   : > { %s514_s12 = smov %s440_s15  ;;  %14 = sbr.rel (!%p12_p9) target bundleno = 3 (0x3), region = 66 }
 0x1e0   :  { %231 = vsyncpa [#allocation3], 1 }
 0x1e1   :  { %233 = vsyncpa [#allocation3 + $0x1], 1 }

</bundles_post_ra>
